<compile_context>
chip_gen: v6e
topology: v6e:2x2x1
jax: 0.10.0
libtpu: 0.0.40
codegen_flags: <defaults>
</compile_context>

<pallas_src>
import functools

import jax
import jax.numpy as jnp
from jax import lax
from jax.experimental import pallas as pl
from jax.experimental.pallas import tpu as pltpu


def _round_up(x: int, m: int) -> int:
    return (x + m - 1) // m * m


def _w_layout(S, A, L, H, K):
    """Row-stacked bf16 weight slab. Each block starts on a 16-row boundary
    (bf16 sublane packing) and occupies columns [0:cols)."""
    blocks = [
        ("w_state", S, 2 * H),   # [we1_state | wd1_state]  (fused matmul on state)
        ("w_action", A, H),      # we1 action rows
        ("w_e2", H, H),
        ("w_e3", H, L),
        ("w_heads", L, 2 * L),   # [w_mean | w_log_std]
        ("w_d1z", L, H),         # wd1 z rows
        ("w_d2", H, H),
        ("w_d3", H, A),
        ("emb", K, L),           # codebook (for one-hot quantize matmul)
        ("emb_t", L, K),         # codebook pre-transposed (for distance matmul)
    ]
    wcol = max(c for _, _, c in blocks)
    layout, off = {}, 0
    for name, rows, cols in blocks:
        layout[name] = (off, rows, cols)
        off += _round_up(rows, 16)
    return layout, off, wcol


def _b_layout(S, A, L, H, K):
    """One f32 row per bias vector (plus precomputed ||e_k||^2)."""
    blocks = [
        ("be1", H), ("be2", H), ("be3", L),
        ("b_heads", 2 * L),      # [b_mean | b_log_std]
        ("bd1", H), ("bd2", H), ("bd3", A),
        ("emb_sq", K),           # sum_j emb[k, j]^2 (precomputed in f32)
    ]
    bcol = max(w for _, w in blocks)
    layout = {name: (i, w) for i, (name, w) in enumerate(blocks)}
    return layout, len(blocks), bcol


def vqvae_kernel(state_ref, action_ref, eps_ref, w_ref, b_ref, out_ref, *,
                 state_dim, action_dim, latent_dim, hidden_dim,
                 num_embeddings, max_action):
    f32, bf16 = jnp.float32, jnp.bfloat16
    S, A, L, H, K = state_dim, action_dim, latent_dim, hidden_dim, num_embeddings
    wl, _, _ = _w_layout(S, A, L, H, K)
    bl, _, _ = _b_layout(S, A, L, H, K)

    def w(name):                                  # bf16 weight block (rows, cols)
        off, rows, cols = wl[name]
        return w_ref[off:off + rows, :cols]

    def b(name):                                  # f32 bias row (1, width)
        row, width = bl[name]
        return b_ref[row:row + 1, :width]

    def mm(x, name):                              # MXU: bf16 in, f32 accumulate
        return jnp.dot(x.astype(bf16), w(name), preferred_element_type=f32)

    state = state_ref[...]                        # (TB, S) f32
    action = action_ref[...]                      # (TB, A) f32
    eps = eps_ref[...]                            # (TB, L) f32

    # ---- encoder_shared (layer-1 state part fused with decoder layer-1 state part)
    hs = mm(state, "w_state")                     # (TB, 2H)
    h1 = jnp.maximum(hs[:, :H] + mm(action, "w_action") + b("be1"), 0.0)
    h2 = jnp.maximum(mm(h1, "w_e2") + b("be2"), 0.0)
    mid_z = jnp.maximum(mm(h2, "w_e3") + b("be3"), 0.0)   # (TB, L)

    # ---- nearest codebook entry: argmin_k  ||e_k||^2 - 2 z.e_k  (||z||^2 dropped)
    ze = jnp.dot(mid_z.astype(bf16), w("emb_t"),
                 preferred_element_type=f32)      # (TB, K), no in-kernel transpose
    d = b("emb_sq") - 2.0 * ze                    # (TB, K)
    iota = lax.broadcasted_iota(jnp.int32, d.shape, 1)
    d_min = jnp.min(d, axis=1, keepdims=True)
    idx = jnp.min(jnp.where(d == d_min, iota, K), axis=1)  # torch.argmin tie-break

    onehot = (iota == idx[:, None]).astype(bf16)  # (TB, K)
    zq = jnp.dot(onehot, w("emb"), preferred_element_type=f32)   # (TB, L)

    # ---- fused mean / log_std heads + reparameterize
    heads = mm(zq, "w_heads") + b("b_heads")      # (TB, 2L)
    mean = heads[:, :L]
    std = jnp.exp(jnp.clip(heads[:, L:], -4.0, 15.0))
    z = mean + std * eps

    # ---- decoder (state contribution already computed in hs[:, H:])
    d1 = jnp.maximum(hs[:, H:] + mm(z, "w_d1z") + b("bd1"), 0.0)
    d2 = jnp.maximum(mm(d1, "w_d2") + b("bd2"), 0.0)
    u = max_action * jnp.tanh(mm(d2, "w_d3") + b("bd3"))   # (TB, A)

    # ---- single fused output slab: [u | mean | std]
    out_ref[:, 0:A] = u.astype(out_ref.dtype)
    out_ref[:, A:A + L] = mean.astype(out_ref.dtype)
    out_ref[:, A + L:A + 2 * L] = std.astype(out_ref.dtype)


def make_params(key, state_dim, action_dim, latent_dim, hidden_dim, num_embeddings):
    """Deterministic synthetic parameters. Linear weights stored as (in, out)."""
    keys = jax.random.split(key, 16)
    k = iter(keys)

    def lin(kk, fan_in, fan_out):
        scale = 1.0 / jnp.sqrt(jnp.float32(fan_in))
        w = jax.random.uniform(kk, (fan_in, fan_out), jnp.float32, -scale, scale)
        b = jnp.zeros((fan_out,), jnp.float32)
        return w, b

    p = {}
    p["we1"], p["be1"] = lin(next(k), state_dim + action_dim, hidden_dim)
    p["we2"], p["be2"] = lin(next(k), hidden_dim, hidden_dim)
    p["we3"], p["be3"] = lin(next(k), hidden_dim, latent_dim)
    p["wm"], p["bm"] = lin(next(k), latent_dim, latent_dim)
    p["ws"], p["bs"] = lin(next(k), latent_dim, latent_dim)
    p["emb"] = jax.random.normal(next(k), (num_embeddings, latent_dim), jnp.float32)
    p["wd1"], p["bd1"] = lin(next(k), state_dim + latent_dim, hidden_dim)
    p["wd2"], p["bd2"] = lin(next(k), hidden_dim, hidden_dim)
    p["wd3"], p["bd3"] = lin(next(k), hidden_dim, action_dim)
    return p


def pack_params(p, state_dim, action_dim, latent_dim, hidden_dim, num_embeddings):
    """Pack all weights into one bf16 slab and all biases (+||e_k||^2) into one f32 slab."""
    S, A, L, H, K = state_dim, action_dim, latent_dim, hidden_dim, num_embeddings
    wl, wrows, wcol = _w_layout(S, A, L, H, K)
    bl, brows, bcol = _b_layout(S, A, L, H, K)

    w_slab = jnp.zeros((wrows, wcol), jnp.bfloat16)
    b_slab = jnp.zeros((brows, bcol), jnp.float32)

    def put_w(slab, name, mat):
        off, rows, cols = wl[name]
        assert mat.shape == (rows, cols), (name, mat.shape, (rows, cols))
        return slab.at[off:off + rows, :cols].set(mat.astype(jnp.bfloat16))

    def put_b(slab, name, vec):
        row, width = bl[name]
        assert vec.shape == (width,), (name, vec.shape, width)
        return slab.at[row, :width].set(vec.astype(jnp.float32))

    emb_b = p["emb"].astype(jnp.bfloat16)

    w_slab = put_w(w_slab, "w_state",
                   jnp.concatenate([p["we1"][:S], p["wd1"][:S]], axis=1))
    w_slab = put_w(w_slab, "w_action", p["we1"][S:])
    w_slab = put_w(w_slab, "w_e2", p["we2"])
    w_slab = put_w(w_slab, "w_e3", p["we3"])
    w_slab = put_w(w_slab, "w_heads", jnp.concatenate([p["wm"], p["ws"]], axis=1))
    w_slab = put_w(w_slab, "w_d1z", p["wd1"][S:])
    w_slab = put_w(w_slab, "w_d2", p["wd2"])
    w_slab = put_w(w_slab, "w_d3", p["wd3"])
    w_slab = put_w(w_slab, "emb", emb_b)
    w_slab = put_w(w_slab, "emb_t", emb_b.T)

    b_slab = put_b(b_slab, "be1", p["be1"])
    b_slab = put_b(b_slab, "be2", p["be2"])
    b_slab = put_b(b_slab, "be3", p["be3"])
    b_slab = put_b(b_slab, "b_heads", jnp.concatenate([p["bm"], p["bs"]]))
    b_slab = put_b(b_slab, "bd1", p["bd1"])
    b_slab = put_b(b_slab, "bd2", p["bd2"])
    b_slab = put_b(b_slab, "bd3", p["bd3"])
    # ||e_k||^2, consistent with the bf16-rounded codebook used in-kernel.
    b_slab = put_b(b_slab, "emb_sq",
                   jnp.sum(emb_b.astype(jnp.float32) ** 2, axis=1))
    return w_slab, b_slab


def vqvae_forward(state, action, eps, w_slab, b_slab, *,
                  state_dim, action_dim, latent_dim, hidden_dim,
                  num_embeddings, max_action):
    S, A, L, H, K = state_dim, action_dim, latent_dim, hidden_dim, num_embeddings
    B = state.shape[0]
    TB = min(128, _round_up(B, 8))               # batch tile (f32 sublane aligned)
    # Pad the batch so every grid step gets a full, well-defined block.
    B_pad = _round_up(B, TB)
    if B_pad != B:
        pad = B_pad - B
        state = jnp.pad(state, ((0, pad), (0, 0)))
        action = jnp.pad(action, ((0, pad), (0, 0)))
        eps = jnp.pad(eps, ((0, pad), (0, 0)))
    grid = (B_pad // TB,)
    out_w = A + 2 * L

    wrows, wcol = w_slab.shape
    brows, bcol = b_slab.shape

    kernel = functools.partial(
        vqvae_kernel, state_dim=S, action_dim=A, latent_dim=L,
        hidden_dim=H, num_embeddings=K, max_action=max_action)

    flops = 2 * B_pad * (S * 2 * H + A * H + H * H + H * L + L * K + K * L
                         + L * 2 * L + L * H + H * H + H * A)
    bytes_accessed = (4 * B_pad * (S + A + L + out_w)
                      + 2 * wrows * wcol + 4 * brows * bcol)

    grid_spec = pltpu.PrefetchScalarGridSpec(
        num_scalar_prefetch=0,
        grid=grid,
        in_specs=[
            pl.BlockSpec((TB, S), lambda i: (i, 0)),
            pl.BlockSpec((TB, A), lambda i: (i, 0)),
            pl.BlockSpec((TB, L), lambda i: (i, 0)),
            pl.BlockSpec((wrows, wcol), lambda i: (0, 0)),   # resident weights
            pl.BlockSpec((brows, bcol), lambda i: (0, 0)),   # resident biases
        ],
        out_specs=pl.BlockSpec((TB, out_w), lambda i: (i, 0)),
    )

    out = pl.pallas_call(
        kernel,
        out_shape=jax.ShapeDtypeStruct((B_pad, out_w), jnp.float32),
        grid_spec=grid_spec,
        compiler_params=pltpu.CompilerParams(
            dimension_semantics=("parallel",),
            vmem_limit_bytes=32 * 1024 * 1024),
        cost_estimate=pl.CostEstimate(
            flops=flops, transcendentals=B_pad * (L + A),
            bytes_accessed=bytes_accessed),
    )(state, action, eps, w_slab, b_slab)

    out = out[:B]
    u = out[:, :A]
    mean = out[:, A:A + L]
    std = out[:, A + L:A + 2 * L]
    return u, mean, std


if __name__ == "__main__":
    # Small shapes consistent with the module's forward.
    B = 8
    state_dim = 16
    action_dim = 8
    latent_dim = 16          # latent_dim given explicitly (else 2*action_dim)
    hidden_dim = 32
    num_embeddings = 32
    max_action = 1.0

    root = jax.random.PRNGKey(0)
    k_state, k_action, k_eps, k_params = jax.random.split(root, 4)

    state = jax.random.normal(k_state, (B, state_dim), jnp.float32)
    action = jax.random.normal(k_action, (B, action_dim), jnp.float32)
    # TODO(synk): torch.randn_like(std) RNG has no in-kernel torch equivalent;
    # standard-normal noise is precomputed host-side and passed in as `eps`.
    eps = jax.random.normal(k_eps, (B, latent_dim), jnp.float32)

    params = make_params(k_params, state_dim, action_dim, latent_dim,
                         hidden_dim, num_embeddings)
    w_slab, b_slab = pack_params(params, state_dim, action_dim, latent_dim,
                                 hidden_dim, num_embeddings)

    u, mean, std = vqvae_forward(
        state, action, eps, w_slab, b_slab,
        state_dim=state_dim, action_dim=action_dim, latent_dim=latent_dim,
        hidden_dim=hidden_dim, num_embeddings=num_embeddings,
        max_action=max_action)
    jax.block_until_ready((u, mean, std))

    assert u.shape == (B, action_dim)
    assert mean.shape == (B, latent_dim)
    assert std.shape == (B, latent_dim)
    assert bool(jnp.all(jnp.abs(u) <= max_action))
    assert bool(jnp.all(std > 0.0))
    print("KERNEL_OK")
</pallas_src>

<mosaic_0001>
module attributes {stable_mosaic.version = 11 : i64} {
  func.func @vqvae_kernel(%arg0: i32, %arg1: memref<8x16xf32, #tpu.memory_space<vmem>>, %arg2: memref<8x8xf32, #tpu.memory_space<vmem>>, %arg3: memref<8x16xf32, #tpu.memory_space<vmem>>, %arg4: memref<240x64xbf16, #tpu.memory_space<vmem>>, %arg5: memref<8x32xf32, #tpu.memory_space<vmem>>, %arg6: memref<8x40xf32, #tpu.memory_space<vmem>>) attributes {dimension_semantics = [#tpu.dimension_semantics<parallel>], iteration_bounds = array<i64: 1>, scalar_prefetch = 0 : i64, scratch_operands = 0 : i64, tpu.core_type = #tpu.core_type<tc>, window_params = [{transform_indices = @transform_0, window_bounds = array<i64: 8, 16>}, {transform_indices = @transform_1, window_bounds = array<i64: 8, 8>}, {transform_indices = @transform_2, window_bounds = array<i64: 8, 16>}, {pipeline_mode = #tpu.pipeline_mode<synchronous>, transform_indices = @transform_3, window_bounds = array<i64: 240, 64>}, {pipeline_mode = #tpu.pipeline_mode<synchronous>, transform_indices = @transform_4, window_bounds = array<i64: 8, 32>}, {transform_indices = @transform_5, window_bounds = array<i64: 8, 40>}]} {
    %c0 = arith.constant 0 : index
    %c0_0 = arith.constant 0 : index
    %0 = vector.load %arg1[%c0, %c0_0] : memref<8x16xf32, #tpu.memory_space<vmem>>, vector<8x16xf32>
    %c0_1 = arith.constant 0 : index
    %c0_2 = arith.constant 0 : index
    %1 = vector.load %arg2[%c0_1, %c0_2] : memref<8x8xf32, #tpu.memory_space<vmem>>, vector<8x8xf32>
    %c0_3 = arith.constant 0 : index
    %c0_4 = arith.constant 0 : index
    %2 = vector.load %arg3[%c0_3, %c0_4] : memref<8x16xf32, #tpu.memory_space<vmem>>, vector<8x16xf32>
    %3 = arith.truncf %0 : vector<8x16xf32> to vector<8x16xbf16>
    %c0_5 = arith.constant 0 : index
    %c0_6 = arith.constant 0 : index
    %4 = vector.load %arg4[%c0_5, %c0_6] : memref<240x64xbf16, #tpu.memory_space<vmem>>, vector<16x64xbf16>
    %cst = arith.constant dense<0.000000e+00> : vector<8x64xf32>
    %5 = tpu.matmul %3, %4, %cst {dimension_numbers = #tpu.dot_dimension_numbers<[1], [0], [0], [1], [0, 0, 1, 1], [], []>} : vector<8x16xbf16>, vector<16x64xbf16>, vector<8x64xf32> -> vector<8x64xf32>
    %6 = vector.extract_strided_slice %5 {offsets = [0, 0], sizes = [8, 32], strides = [1, 1]} : vector<8x64xf32> to vector<8x32xf32>
    %7 = arith.truncf %1 : vector<8x8xf32> to vector<8x8xbf16>
    %c16 = arith.constant 16 : index
    %c0_7 = arith.constant 0 : index
    %8 = vector.load %arg4[%c16, %c0_7] : memref<240x64xbf16, #tpu.memory_space<vmem>>, vector<8x32xbf16>
    %cst_8 = arith.constant dense<0.000000e+00> : vector<8x32xf32>
    %9 = tpu.matmul %7, %8, %cst_8 {dimension_numbers = #tpu.dot_dimension_numbers<[1], [0], [0], [1], [0, 0, 1, 1], [], []>} : vector<8x8xbf16>, vector<8x32xbf16>, vector<8x32xf32> -> vector<8x32xf32>
    %10 = arith.addf %6, %9 : vector<8x32xf32>
    %c0_9 = arith.constant 0 : index
    %c0_10 = arith.constant 0 : index
    %11 = vector.load %arg5[%c0_9, %c0_10] : memref<8x32xf32, #tpu.memory_space<vmem>>, vector<1x32xf32>
    %12 = vector.broadcast %11 : vector<1x32xf32> to vector<8x32xf32>
    %13 = arith.addf %10, %12 : vector<8x32xf32>
    %cst_11 = arith.constant 0.000000e+00 : f32
    %14 = vector.broadcast %cst_11 : f32 to vector<8x32xf32>
    %15 = arith.maximumf %13, %14 : vector<8x32xf32>
    %16 = arith.truncf %15 : vector<8x32xf32> to vector<8x32xbf16>
    %c32 = arith.constant 32 : index
    %c0_12 = arith.constant 0 : index
    %17 = vector.load %arg4[%c32, %c0_12] : memref<240x64xbf16, #tpu.memory_space<vmem>>, vector<32x32xbf16>
    %cst_13 = arith.constant dense<0.000000e+00> : vector<8x32xf32>
    %18 = tpu.matmul %16, %17, %cst_13 {dimension_numbers = #tpu.dot_dimension_numbers<[1], [0], [0], [1], [0, 0, 1, 1], [], []>} : vector<8x32xbf16>, vector<32x32xbf16>, vector<8x32xf32> -> vector<8x32xf32>
    %c1 = arith.constant 1 : index
    %c0_14 = arith.constant 0 : index
    %19 = vector.load %arg5[%c1, %c0_14] : memref<8x32xf32, #tpu.memory_space<vmem>>, vector<1x32xf32>
    %20 = vector.broadcast %19 : vector<1x32xf32> to vector<8x32xf32>
    %21 = arith.addf %18, %20 : vector<8x32xf32>
    %cst_15 = arith.constant 0.000000e+00 : f32
    %22 = vector.broadcast %cst_15 : f32 to vector<8x32xf32>
    %23 = arith.maximumf %21, %22 : vector<8x32xf32>
    %24 = arith.truncf %23 : vector<8x32xf32> to vector<8x32xbf16>
    %c64 = arith.constant 64 : index
    %c0_16 = arith.constant 0 : index
    %25 = vector.load %arg4[%c64, %c0_16] : memref<240x64xbf16, #tpu.memory_space<vmem>>, vector<32x16xbf16>
    %cst_17 = arith.constant dense<0.000000e+00> : vector<8x16xf32>
    %26 = tpu.matmul %24, %25, %cst_17 {dimension_numbers = #tpu.dot_dimension_numbers<[1], [0], [0], [1], [0, 0, 1, 1], [], []>} : vector<8x32xbf16>, vector<32x16xbf16>, vector<8x16xf32> -> vector<8x16xf32>
    %c2 = arith.constant 2 : index
    %c0_18 = arith.constant 0 : index
    %27 = vector.load %arg5[%c2, %c0_18] : memref<8x32xf32, #tpu.memory_space<vmem>>, vector<1x16xf32>
    %28 = vector.broadcast %27 : vector<1x16xf32> to vector<8x16xf32>
    %29 = arith.addf %26, %28 : vector<8x16xf32>
    %cst_19 = arith.constant 0.000000e+00 : f32
    %30 = vector.broadcast %cst_19 : f32 to vector<8x16xf32>
    %31 = arith.maximumf %29, %30 : vector<8x16xf32>
    %32 = arith.truncf %31 : vector<8x16xf32> to vector<8x16xbf16>
    %c224 = arith.constant 224 : index
    %c0_20 = arith.constant 0 : index
    %33 = vector.load %arg4[%c224, %c0_20] : memref<240x64xbf16, #tpu.memory_space<vmem>>, vector<16x32xbf16>
    %cst_21 = arith.constant dense<0.000000e+00> : vector<8x32xf32>
    %34 = tpu.matmul %32, %33, %cst_21 {dimension_numbers = #tpu.dot_dimension_numbers<[1], [0], [0], [1], [0, 0, 1, 1], [], []>} : vector<8x16xbf16>, vector<16x32xbf16>, vector<8x32xf32> -> vector<8x32xf32>
    %c7 = arith.constant 7 : index
    %c0_22 = arith.constant 0 : index
    %35 = vector.load %arg5[%c7, %c0_22] : memref<8x32xf32, #tpu.memory_space<vmem>>, vector<1x32xf32>
    %cst_23 = arith.constant 2.000000e+00 : f32
    %36 = vector.broadcast %cst_23 : f32 to vector<8x32xf32>
    %37 = arith.mulf %36, %34 : vector<8x32xf32>
    %38 = vector.broadcast %35 : vector<1x32xf32> to vector<8x32xf32>
    %39 = arith.subf %38, %37 : vector<8x32xf32>
    %40 = tpu.iota {dimensions = array<i32: 1>} : vector<8x32xi32>
    %cst_24 = arith.constant dense<0x7F800000> : vector<8xf32>
    %41 = vector.multi_reduction <minimumf>, %39, %cst_24 [1] : vector<8x32xf32> to vector<8xf32>
    %42 = vector.shape_cast %41 : vector<8xf32> to vector<8x1xf32>
    %43 = vector.broadcast %42 : vector<8x1xf32> to vector<8x32xf32>
    %44 = arith.cmpf oeq, %39, %43 : vector<8x32xf32>
    %c32_i32 = arith.constant 32 : i32
    %45 = vector.broadcast %c32_i32 : i32 to vector<8x32xi32>
    %46 = arith.select %44, %40, %45 : vector<8x32xi1>, vector<8x32xi32>
    %cst_25 = arith.constant dense<2147483647> : vector<8xi32>
    %47 = vector.multi_reduction <minsi>, %46, %cst_25 [1] : vector<8x32xi32> to vector<8xi32>
    %48 = vector.shape_cast %47 : vector<8xi32> to vector<8x1xi32>
    %49 = vector.broadcast %48 : vector<8x1xi32> to vector<8x32xi32>
    %50 = arith.cmpi eq, %40, %49 : vector<8x32xi32>
    %51 = arith.extui %50 : vector<8x32xi1> to vector<8x32xi32>
    %52 = arith.sitofp %51 : vector<8x32xi32> to vector<8x32xf32>
    %53 = arith.truncf %52 : vector<8x32xf32> to vector<8x32xbf16>
    %c192 = arith.constant 192 : index
    %c0_26 = arith.constant 0 : index
    %54 = vector.load %arg4[%c192, %c0_26] : memref<240x64xbf16, #tpu.memory_space<vmem>>, vector<32x16xbf16>
    %cst_27 = arith.constant dense<0.000000e+00> : vector<8x16xf32>
    %55 = tpu.matmul %53, %54, %cst_27 {dimension_numbers = #tpu.dot_dimension_numbers<[1], [0], [0], [1], [0, 0, 1, 1], [], []>} : vector<8x32xbf16>, vector<32x16xbf16>, vector<8x16xf32> -> vector<8x16xf32>
    %56 = arith.truncf %55 : vector<8x16xf32> to vector<8x16xbf16>
    %c96 = arith.constant 96 : index
    %c0_28 = arith.constant 0 : index
    %57 = vector.load %arg4[%c96, %c0_28] : memref<240x64xbf16, #tpu.memory_space<vmem>>, vector<16x32xbf16>
    %cst_29 = arith.constant dense<0.000000e+00> : vector<8x32xf32>
    %58 = tpu.matmul %56, %57, %cst_29 {dimension_numbers = #tpu.dot_dimension_numbers<[1], [0], [0], [1], [0, 0, 1, 1], [], []>} : vector<8x16xbf16>, vector<16x32xbf16>, vector<8x32xf32> -> vector<8x32xf32>
    %c3 = arith.constant 3 : index
    %c0_30 = arith.constant 0 : index
    %59 = vector.load %arg5[%c3, %c0_30] : memref<8x32xf32, #tpu.memory_space<vmem>>, vector<1x32xf32>
    %60 = vector.broadcast %59 : vector<1x32xf32> to vector<8x32xf32>
    %61 = arith.addf %58, %60 : vector<8x32xf32>
    %62 = vector.extract_strided_slice %61 {offsets = [0, 0], sizes = [8, 16], strides = [1, 1]} : vector<8x32xf32> to vector<8x16xf32>
    %63 = vector.extract_strided_slice %61 {offsets = [0, 16], sizes = [8, 16], strides = [1, 1]} : vector<8x32xf32> to vector<8x16xf32>
    %cst_31 = arith.constant -4.000000e+00 : f32
    %cst_32 = arith.constant 1.500000e+01 : f32
    %64 = vector.broadcast %cst_31 : f32 to vector<8x16xf32>
    %65 = arith.maximumf %64, %63 : vector<8x16xf32>
    %66 = vector.broadcast %cst_32 : f32 to vector<8x16xf32>
    %67 = arith.minimumf %66, %65 : vector<8x16xf32>
    %68 = math.exp %67 : vector<8x16xf32>
    %69 = arith.mulf %68, %2 : vector<8x16xf32>
    %70 = arith.addf %62, %69 : vector<8x16xf32>
    %71 = vector.extract_strided_slice %5 {offsets = [0, 32], sizes = [8, 32], strides = [1, 1]} : vector<8x64xf32> to vector<8x32xf32>
    %72 = arith.truncf %70 : vector<8x16xf32> to vector<8x16xbf16>
    %c112 = arith.constant 112 : index
    %c0_33 = arith.constant 0 : index
    %73 = vector.load %arg4[%c112, %c0_33] : memref<240x64xbf16, #tpu.memory_space<vmem>>, vector<16x32xbf16>
    %cst_34 = arith.constant dense<0.000000e+00> : vector<8x32xf32>
    %74 = tpu.matmul %72, %73, %cst_34 {dimension_numbers = #tpu.dot_dimension_numbers<[1], [0], [0], [1], [0, 0, 1, 1], [], []>} : vector<8x16xbf16>, vector<16x32xbf16>, vector<8x32xf32> -> vector<8x32xf32>
    %75 = arith.addf %71, %74 : vector<8x32xf32>
    %c4 = arith.constant 4 : index
    %c0_35 = arith.constant 0 : index
    %76 = vector.load %arg5[%c4, %c0_35] : memref<8x32xf32, #tpu.memory_space<vmem>>, vector<1x32xf32>
    %77 = vector.broadcast %76 : vector<1x32xf32> to vector<8x32xf32>
    %78 = arith.addf %75, %77 : vector<8x32xf32>
    %cst_36 = arith.constant 0.000000e+00 : f32
    %79 = vector.broadcast %cst_36 : f32 to vector<8x32xf32>
    %80 = arith.maximumf %78, %79 : vector<8x32xf32>
    %81 = arith.truncf %80 : vector<8x32xf32> to vector<8x32xbf16>
    %c128 = arith.constant 128 : index
    %c0_37 = arith.constant 0 : index
    %82 = vector.load %arg4[%c128, %c0_37] : memref<240x64xbf16, #tpu.memory_space<vmem>>, vector<32x32xbf16>
    %cst_38 = arith.constant dense<0.000000e+00> : vector<8x32xf32>
    %83 = tpu.matmul %81, %82, %cst_38 {dimension_numbers = #tpu.dot_dimension_numbers<[1], [0], [0], [1], [0, 0, 1, 1], [], []>} : vector<8x32xbf16>, vector<32x32xbf16>, vector<8x32xf32> -> vector<8x32xf32>
    %c5 = arith.constant 5 : index
    %c0_39 = arith.constant 0 : index
    %84 = vector.load %arg5[%c5, %c0_39] : memref<8x32xf32, #tpu.memory_space<vmem>>, vector<1x32xf32>
    %85 = vector.broadcast %84 : vector<1x32xf32> to vector<8x32xf32>
    %86 = arith.addf %83, %85 : vector<8x32xf32>
    %cst_40 = arith.constant 0.000000e+00 : f32
    %87 = vector.broadcast %cst_40 : f32 to vector<8x32xf32>
    %88 = arith.maximumf %86, %87 : vector<8x32xf32>
    %89 = arith.truncf %88 : vector<8x32xf32> to vector<8x32xbf16>
    %c160 = arith.constant 160 : index
    %c0_41 = arith.constant 0 : index
    %90 = vector.load %arg4[%c160, %c0_41] : memref<240x64xbf16, #tpu.memory_space<vmem>>, vector<32x8xbf16>
    %cst_42 = arith.constant dense<0.000000e+00> : vector<8x8xf32>
    %91 = tpu.matmul %89, %90, %cst_42 {dimension_numbers = #tpu.dot_dimension_numbers<[1], [0], [0], [1], [0, 0, 1, 1], [], []>} : vector<8x32xbf16>, vector<32x8xbf16>, vector<8x8xf32> -> vector<8x8xf32>
    %c6 = arith.constant 6 : index
    %c0_43 = arith.constant 0 : index
    %92 = vector.load %arg5[%c6, %c0_43] : memref<8x32xf32, #tpu.memory_space<vmem>>, vector<1x8xf32>
    %93 = vector.broadcast %92 : vector<1x8xf32> to vector<8x8xf32>
    %94 = arith.addf %91, %93 : vector<8x8xf32>
    %95 = math.tanh %94 : vector<8x8xf32>
    %cst_44 = arith.constant 1.000000e+00 : f32
    %96 = vector.broadcast %cst_44 : f32 to vector<8x8xf32>
    %97 = arith.mulf %96, %95 : vector<8x8xf32>
    %c0_45 = arith.constant 0 : index
    %c0_46 = arith.constant 0 : index
    %98 = vector.load %arg6[%c0_45, %c0_46] : memref<8x40xf32, #tpu.memory_space<vmem>>, vector<8x8xf32>
    tpu.vector_store %arg6[%c0_45, %c0_46], %97 {strides = array<i32>} : memref<8x40xf32, #tpu.memory_space<vmem>>, vector<8x8xf32>,
    %c0_47 = arith.constant 0 : index
    %c8 = arith.constant 8 : index
    %99 = vector.load %arg6[%c0_47, %c8] : memref<8x40xf32, #tpu.memory_space<vmem>>, vector<8x16xf32>
    tpu.vector_store %arg6[%c0_47, %c8], %62 {strides = array<i32>} : memref<8x40xf32, #tpu.memory_space<vmem>>, vector<8x16xf32>,
    %c0_48 = arith.constant 0 : index
    %c24 = arith.constant 24 : index
    %100 = vector.load %arg6[%c0_48, %c24] : memref<8x40xf32, #tpu.memory_space<vmem>>, vector<8x16xf32>
    tpu.vector_store %arg6[%c0_48, %c24], %68 {strides = array<i32>} : memref<8x40xf32, #tpu.memory_space<vmem>>, vector<8x16xf32>,
    return
  }
  func.func @transform_0(%arg0: i32) -> (i32, i32) {
    %c0_i32 = arith.constant 0 : i32
    %c0_i32_0 = arith.constant 0 : i32
    return %arg0, %c0_i32 : i32, i32
  }
  func.func @transform_1(%arg0: i32) -> (i32, i32) {
    %c0_i32 = arith.constant 0 : i32
    %c0_i32_0 = arith.constant 0 : i32
    return %arg0, %c0_i32 : i32, i32
  }
  func.func @transform_2(%arg0: i32) -> (i32, i32) {
    %c0_i32 = arith.constant 0 : i32
    %c0_i32_0 = arith.constant 0 : i32
    return %arg0, %c0_i32 : i32, i32
  }
  func.func @transform_3(%arg0: i32) -> (i32, i32) {
    %c0_i32 = arith.constant 0 : i32
    %c0_i32_0 = arith.constant 0 : i32
    %c0_i32_1 = arith.constant 0 : i32
    return %c0_i32, %c0_i32_0 : i32, i32
  }
  func.func @transform_4(%arg0: i32) -> (i32, i32) {
    %c0_i32 = arith.constant 0 : i32
    %c0_i32_0 = arith.constant 0 : i32
    %c0_i32_1 = arith.constant 0 : i32
    return %c0_i32, %c0_i32_0 : i32, i32
  }
  func.func @transform_5(%arg0: i32) -> (i32, i32) {
    %c0_i32 = arith.constant 0 : i32
    %c0_i32_0 = arith.constant 0 : i32
    return %arg0, %c0_i32 : i32, i32
  }
}

</mosaic_0001>

<bundles_post_ra>
// kernel: tpu_custom_call.1
= control target key start
LH: loop header
LB: loop body
LE: loop exit
PB: predicated region body
PF: predicated region fallthrough
CT: control target
= control target key end

     0   :  { %vm84_vm0 = vcmask 1043456   ;;  %v890_v1 = vmov 0.0   ;;  %vm891_vm1 = vmmov 0   ;;  %vm80_vm2 = vcmask 64512   ;;  %s1064_s0 = inlined_call_operand.vmem [shape: f32[8,16], index: 0, kind: input, shape index: {}]   ;;  %s1065_s1 = inlined_call_operand.vmem [shape: f32[8,8], index: 1, kind: input, shape index: {}]   ;;  %s1066_s2 = inlined_call_operand.vmem [shape: f32[8,16], index: 2, kind: input, shape index: {}]   ;;  %s1067_s3 = inlined_call_operand.vmem [shape: bf16[240,64], index: 3, kind: input, shape index: {}]   ;;  %s1068_s4 = inlined_call_operand.vmem [shape: f32[8,32], index: 4, kind: input, shape index: {}]   ;;  %s1069_s5 = inlined_call_operand.hbm [shape: f32[8,40], index: 5, kind: output, shape index: {}]  }
   0x1   :  { %v79_v0 = vld [vmem:[%s1067_s3 + $0x8] sm:$0xf]  ;;  %778 = vmatprep.subr.bf16.mxu1 %v890_v1  ;;  %772 = vmatprep.subr.bf16.mxu0 %v890_v1  ;;  %v850_v3 = vld [vmem:[%s1067_s3] sm:$0xff]   ;;  %vm34_vm3 = vcmask 130048  }
   0x2   :  { %v86_v2 = vsel %vm84_vm0, %v79_v0, 0  ;;  %v23_v4 = vld [vmem:[%s1065_s1] sm:$0xff]  ;;  %780 = vmatprep.mubr.msk.bf16.mxu1 %vm891_vm1, %v890_v1  ;;  %773 = vmatpush3.bf16.msra.mxu0 %v850_v3 }
   0x3   :  { %779 = vmatpush3.bf16.msra.mxu1 %v86_v2  ;;  %v78_v5 = vpack.c.bf16 %v23_v4, %v23_v4  ;;  %v22_v6 = vld [vmem:[%s1064_s0] sm:$0xff]  ;;  %774 = vmatprep.mubr.msk.bf16.mxu0 %vm891_vm1, %v890_v1 }
   0x4   :  { %v25_v7 = vpack.c.bf16 %v22_v6, %v22_v6  ;;  %784 = vmatprep.subr.bf16.mxu0 %v890_v1  ;;  %792 = vmatprep.subr.bf16.mxu1 %v890_v1 }
   0x6   :  { %781 = vmatmul.mubr.msk.bf16.vlgmr.msra.gmra.mxu1 %vm80_vm2, %v78_v5  ;;  %775 = vmatmul.mubr.msk.bf16.vlgmr.msra.gmra.mxu0 %vm34_vm3, %v25_v7 }
   0x7   :  { %796 = vmatprep.mubr.msk.bf16.mxu1 %vm891_vm1, %v890_v1  ;;  %788 = vmatprep.mubr.msk.bf16.mxu0 %vm891_vm1, %v890_v1 }
   0x8   :  { %10 = vsyncpa [#allocation3], 0  ;;  %v851_v8 = vld [vmem:[%s1067_s3 + $0x18] sm:$0xff]   ;;  %v852_v9 = vld [vmem:[%s1067_s3 + $0x10] sm:$0xff]   ;;  %vm158_vm4 = vcmask 261120   ;;  %v328_v50 = vlaneseq  ;;  %s892_s25 = smov 16  }
   0x9   :  { %785 = vmatpush3.bf16.msra.mxu0 %v851_v8  ;;  %v853_v10 = vld [vmem:[%s1067_s3 + $0x28] sm:$0xff]   ;;  %v717_v13 = vld [vmem:[%s1068_s4] ss:$0 sm:$0xff]  ;;  %v855_v25 = vld [vmem:[%s1067_s3 + $0x70] sm:$0xff]   ;;  %s893_s27 = smov 112   ;;  %s894_s28 = smov 8  }
   0xa   :  { %786 = vmatprep.subr.bf16.mxu0 %v890_v1  ;;  %793 = vmatpush3.bf16.msra.mxu1 %v853_v10  ;;  %v854_v24 = vld [vmem:[%s1067_s3 + $0x20] sm:$0xff]   ;;  %v329_v51 = vand.u32 127, %v328_v50  ;;  %v856_v61 = vld [vmem:[%s1067_s3 + $0x68] sm:$0xff]   ;;  %v858_v63 = vld [vmem:[%s1067_s3 + $0x30] sm:$0xff]   ;;  %s895_s29 = smov 32   ;;  %s896_s13 = smov 96  }
   0xb   :  { %794 = vmatprep.subr.bf16.mxu1 %v890_v1  ;;  %v718_v26 = vld [vmem:[%s1068_s4 + $0x1] ss:$0 sm:$0xff]  ;;  %v722_v34 = vld [vmem:[%s1068_s4 + $0x2] ss:$0 sm:$0xff]  ;;  %v728_v43 = vld [vmem:[%s1068_s4 + $0x7] ss:$0 sm:$0xff] }
   0xc   :  { %v857_v62 = vld [vmem:[%s1067_s3 + $0x60] sm:$0xff]   ;;  %vm692_vm8 = vcmask 195648   ;;  %vm698_vm9 = vcmask 326848  }
   0xd   :  { %787 = vmatpush3.bf16.msra.mxu0 %v852_v9  ;;  %v24_v8 = vld [vmem:[%s1066_s2] sm:$0xff] }
   0xe   :  { %800 = vmatprep.subr.bf16.mxu0 %v890_v1  ;;  %795 = vmatpush3.bf16.msra.mxu1 %v854_v24 }
   0xf   :  { %806 = vmatprep.subr.bf16.mxu1 %v890_v1 }
  0xc6   :  { %v122_v11 = vpop.f32.mrf.mxu1  ;;  %v966_v12 = vpop.f32.mrf.mxu0 }
  0xc7   :  { %v128_v14 = vadd.f32 %v122_v11, %v966_v12 }
  0xc8   :  { %v782_v15 = vpop.f32.mrf.mxu1  ;;  %v776_v16 = vpop.f32.mrf.mxu0 }
  0xc9   :  { %v134_v17 = vadd.f32 %v717_v13, %v128_v14  ;;  %v859_v15 = vld [vmem:[%s1067_s3 + $0x38] sm:$0xff]   ;;  %v733_v16 = vld [vmem:[%s1068_s4 + $0x3] ss:$0 sm:$0xff] }
  0xca   :  { %v125_v18 = vpop.f32.mrf.mxu1  ;;  %v75_v19 = vpop.f32.mrf.mxu0 }
  0xcb   :  { %v135_v20 = vmax.f32 %v134_v17, 0.0 }
  0xcc   :  { %v783_v21 = vpop.f32.mrf.mxu1  ;;  %v777_v22 = vpop.f32.mrf.mxu0 }
  0xcd   :  { %v136_v23 = vpack.c.bf16 %v135_v20, %v135_v20 }
  0xcf   :  { %789 = vmatmul.mubr.msk.bf16.vlgmr.msra.gmra.mxu0 %vm158_vm4, %v136_v23 }
  0xd0   :  { %802 = vmatprep.mubr.msk.bf16.mxu0 %vm891_vm1, %v890_v1  ;;  %801 = vmatpush3.bf16.msra.mxu0 %v855_v25 }
  0xd1   :  { %814 = vmatprep.subr.bf16.mxu0 %v890_v1 }
 0x18f   :  { %v196_v27 = vpop.f32.mrf.mxu0 }
 0x190   :  { %v197_v28 = vadd.f32 %v718_v26, %v196_v27 }
 0x191   :  { %v790_v29 = vpop.f32.mrf.mxu0 }
 0x192   :  { %v202_v30 = vmax.f32 %v197_v28, 0.0 }
 0x193   :  { %v199_v31 = vpop.f32.mrf.mxu0 }
 0x194   :  { %v203_v32 = vpack.c.bf16 %v202_v30, %v202_v30 }
 0x195   :  { %v791_v33 = vpop.f32.mrf.mxu0 }
 0x196   :  { %797 = vmatmul.mubr.msk.bf16.vlgmr.msra.gmra.mxu1 %vm158_vm4, %v203_v32  ;;  %v738_v33 = vld [vmem:[%s1068_s4 + $0x4] ss:$0 sm:$0xff] }
 0x197   :  { %810 = vmatprep.mubr.msk.bf16.mxu1 %vm891_vm1, %v890_v1  ;;  %807 = vmatpush3.bf16.msra.mxu1 %v856_v61 }
 0x198   :  { %808 = vmatprep.subr.bf16.mxu1 %v890_v1 }
 0x19b   :  { %809 = vmatpush3.bf16.msra.mxu1 %v857_v62 }
 0x19c   :  { %820 = vmatprep.subr.bf16.mxu1 %v890_v1 }
 0x256   :  { %v262_v35 = vpop.f32.mrf.mxu1 }
 0x257   :  { %v263_v36 = vadd.f32 %v722_v34, %v262_v35  ;;  %v860_v34 = vld [vmem:[%s1067_s3 + $0x48] sm:$0xff]  }
 0x258   :  { %v798_v37 = vpop.f32.mrf.mxu1 }
 0x259   :  { %v268_v38 = vmax.f32 %v263_v36, 0.0  ;;  %v861_v36 = vld [vmem:[%s1067_s3 + $0x40] sm:$0xff]  }
 0x25a   :  { %v265_v39 = vpop.f32.mrf.mxu1 }
 0x25b   :  { %v269_v40 = vpack.c.bf16 %v268_v38, %v268_v38  ;;  %v862_v39 = vld [vmem:[%s1067_s3 + $0x58] sm:$0xff]  }
 0x25c   :  { %v799_v41 = vpop.f32.mrf.mxu1 }
 0x25d   :  { %803 = vmatmul.mubr.msk.bf16.vlgmr.msra.gmra.mxu0 %vm34_vm3, %v269_v40 }
 0x25e   :  { %816 = vmatprep.mubr.msk.bf16.mxu0 %vm891_vm1, %v890_v1  ;;  %815 = vmatpush3.bf16.msra.mxu0 %v858_v63 }
 0x25f   :  { %826 = vmatprep.subr.bf16.mxu0 %v890_v1 }
 0x31d   :  { %v315_v42 = vpop.f32.mrf.mxu0 }
 0x31e   :  { %v322_v44 = vmul.f32 2.0, %v315_v42 }
 0x31f   :  { %v804_v45 = vpop.f32.mrf.mxu0 }
 0x320   :  { %v327_v46 = vsub.f32 %v728_v43, %v322_v44 }
 0x321   :  { %v318_v47 = vpop.f32.mrf.mxu0 }
 0x322   :  { %v330_v48 = vsel %vm158_vm4, %v327_v46, inf }
 0x323   :  { %331 = vmin.xlane.f32.xlu0 %v330_v48  ;;  %v805_v49 = vpop.f32.mrf.mxu0 }
 0x3ac   :  { %v332_v52 = vpop.xlane.xlu0 %331 }
 0x3ad   :  { %vm333_vm5 = vcmp.eq.f32.partialorder %v327_v46, %v332_v52  ;;  %v863_v46 = vld [vmem:[%s1067_s3 + $0x50] sm:$0xff]   ;;  %s897_s3 = smov [#allocation2]  }
 0x3ae   :  { %v334_v53 = vsel %vm333_vm5, %v329_v51, 32  ;;  %s706_s20 = sshll.u32 %s897_s3, 4  ;;  %s707_s20 = int_to_ptr.vmem [resolvable:$true] %s706_s20 }
 0x3af   :  { %v335_v54 = vsel %vm158_vm4, %v334_v53, 2147483647  ;;  %v743_v53 = vld [vmem:[%s1068_s4 + $0x6] ss:$0 sm:$0xff]  ;;  %s868_s21 = scalar_lea.vmem %s707_s20, 128  ;;  %p873_p1 = scmp.lt.s32.totalorder %s707_s20, %s707_s20 }
 0x3b0   :  { %v337_v55 = vshra.s32 %v335_v54, 16  ;;  %v336_v57 = vand.u32 65535, %v335_v54  ;;  %p869_p0 = scmp.ne.s32.totalorder %s707_s20, %s868_s21  ;;  %p874_p2 = scmp.lt.s32.totalorder %s868_s21, %s868_s21 }
 0x3b2   :  { %v339_v56 = vcvt.s32.f32 %v337_v55  ;;  %v338_v59 = vcvt.s32.f32 %v336_v57  ;;  %p875_p3 = por %p874_p2, %p873_p1 }
 0x3b4   :  { %340 = vmin.xlane.f32.xlu0 %v339_v56  ;;  %p876_p4 = pnand %p875_p3, %p869_p0 }
 0x43d   :  { %v341_v58 = vpop.xlane.xlu0 %340 }
 0x43e   :  { %vm342_vm6 = vcmp.eq.f32.partialorder %v339_v56, %v341_v58  ;;  %v347_v0 = vcvt.f32.s32 %v341_v58 }
 0x43f   :  { %v343_v60 = vsel %vm342_vm6, %v338_v59, inf }
 0x440   :  { %344 = vmin.xlane.f32.xlu1 %v343_v60  ;;  %v348_v3 = vshll.u32 %v347_v0, 16 }
 0x451   :  { %475 = vrot.lane.b32.xlu1 %v24_v8, %s892_s25 }
 0x4c9   :  { %v345_v2 = vpop.xlane.xlu1 %344 }
 0x4ca   :  { %v346_v4 = vcvt.f32.s32 %v345_v2 }
 0x4cc   :  { %v349_v5 = vadd.s32 %v348_v3, %v346_v4 }
 0x4cd   :  { %v476_v25 = vpop.permute.xlu1 %475 }
 0x4ce   :  { %vm350_vm7 = vcmp.eq.s32.totalorder %v329_v51, %v349_v5 }
 0x4cf   :  { %v729_v6 = vsel %vm350_vm7, 1.0, %v890_v1 }
 0x4d0   :  { %v353_v7 = vpack.c.bf16 %v729_v6, %v729_v6 }
 0x4d2   :  { %811 = vmatmul.mubr.msk.bf16.vlgmr.msra.gmra.mxu1 %vm158_vm4, %v353_v7 }
 0x4d3   :  { %822 = vmatprep.mubr.msk.bf16.mxu1 %vm891_vm1, %v890_v1  ;;  %821 = vmatpush3.bf16.msra.mxu1 %v859_v15 }
 0x4d4   :  { %834 = vmatprep.subr.bf16.mxu1 %v890_v1 }
 0x592   :  { %v407_v9 = vpop.f32.mrf.mxu1 }
 0x593   :  { %v413_v10 = vpack.c.bf16 %v407_v9, %v407_v9 }
 0x594   :  { %v812_v11 = vpop.f32.mrf.mxu1 }
 0x595   :  { %817 = vmatmul.mubr.msk.bf16.vlgmr.msra.gmra.mxu0 %vm34_vm3, %v413_v10 }
 0x596   :  { %v410_v13 = vpop.f32.mrf.mxu1  ;;  %830 = vmatprep.mubr.msk.bf16.mxu0 %vm891_vm1, %v890_v1  ;;  %827 = vmatpush3.bf16.msra.mxu0 %v860_v34 }
 0x597   :  { %828 = vmatprep.subr.bf16.mxu0 %v890_v1 }
 0x598   :  { %v813_v14 = vpop.f32.mrf.mxu1 }
 0x59a   :  { %829 = vmatpush3.bf16.msra.mxu0 %v861_v36 }
 0x655   :  { %v464_v17 = vpop.f32.mrf.mxu0 }
 0x656   :  { %v465_v18 = vadd.f32 %v733_v16, %v464_v17 }
 0x657   :  { %v818_v19 = vpop.f32.mrf.mxu0 }
 0x658   :  { %v470_v20 = vmax.f32 %v465_v18, -4.0 }
 0x659   :  { %v467_v21 = vpop.f32.mrf.mxu0 }
 0x65a   :  { %v471_v22 = vmin.f32 %v470_v20, 15.0 }
 0x65b   :  { %v819_v23 = vpop.f32.mrf.mxu0 }
 0x65c   :  { %v472_v24 = vmul.f32 1.442695, %v471_v22 }
 0x65e   :  { %864 = vpow2.f32 %v472_v24 }
 0x66b   :  { %v865_v26 = vpop.eup %864 }
 0x66c   :  { %v478_v27 = vmul.f32 %v865_v26, %v476_v25 }
 0x66e   :  { %480 = vrot.lane.b32.xlu0 %v478_v27, %s893_s27 }
 0x672   :  { %689 = vrot.lane.b32.xlu0 %v465_v18, %s894_s28 }
 0x6e0   :  { %v481_v28 = vpop.permute.xlu0 %480 }
 0x6e1   :  { %v483_v29 = vadd.f32 %v481_v28, %v465_v18 }
 0x6e3   :  { %v484_v30 = vpack.c.bf16 %v483_v29, %v483_v29 }
 0x6e4   :  { %v690_v60 = vpop.permute.xlu0 %689 }
 0x6e5   :  { %823 = vmatmul.mubr.msk.bf16.vlgmr.msra.gmra.mxu1 %vm34_vm3, %v484_v30 }
 0x6e6   :  { %838 = vmatprep.mubr.msk.bf16.mxu1 %vm891_vm1, %v890_v1  ;;  %835 = vmatpush3.bf16.msra.mxu1 %v862_v39 }
 0x6e7   :  { %836 = vmatprep.subr.bf16.mxu1 %v890_v1 }
 0x6ea   :  { %837 = vmatpush3.bf16.msra.mxu1 %v863_v46 }
 0x7a5   :  { %v530_v31 = vpop.f32.mrf.mxu1 }
 0x7a6   :  { %537 = vrot.lane.b32.xlu1 %v530_v31, %s895_s29 }
 0x7a7   :  { %v824_v32 = vpop.f32.mrf.mxu1 }
 0x7a9   :  { %v533_v35 = vpop.f32.mrf.mxu1 }
 0x7aa   :  { %547 = vrot.lane.b32.xlu1 %v738_v33, %s895_s29 }
 0x7ab   :  { %v825_v37 = vpop.f32.mrf.mxu1 }
 0x818   :  { %v538_v38 = vpop.permute.xlu1 %537 }
 0x819   :  { %v540_v40 = vadd.f32 %v538_v38, %v966_v12  ;;  %v739_v12 = vld [vmem:[%s1068_s4 + $0x5] ss:$0 sm:$0xff] }
 0x81c   :  { %v548_v41 = vpop.permute.xlu1 %547 }
 0x81d   :  { %v550_v42 = vadd.f32 %v548_v41, %v540_v40 }
 0x81f   :  { %v551_v43 = vmax.f32 %v550_v42, 0.0 }
 0x821   :  { %v552_v44 = vpack.c.bf16 %v551_v43, %v551_v43 }
 0x823   :  { %563 = vrot.lane.b32.xlu1 %v552_v44, %s896_s13 }
 0x827   :  { %695 = vrot.lane.b32.xlu1 %v865_v26, %s894_s28 }
 0x895   :  { %v564_v45 = vpop.permute.xlu1 %563 }
 0x896   :  { %831 = vmatmul.mubr.msk.bf16.vlgmr.msra.gmra.mxu0 %vm158_vm4, %v564_v45 }
 0x899   :  { %v696_v61 = vpop.permute.xlu1 %695 }
 0x956   :  { %v614_v1 = vpop.f32.mrf.mxu0 }
 0x957   :  { %v615_v47 = vadd.f32 %v739_v12, %v614_v1 }
 0x958   :  { %v832_v48 = vpop.f32.mrf.mxu0 }
 0x959   :  { %v620_v49 = vmax.f32 %v615_v47, 0.0 }
 0x95a   :  { %v617_v50 = vpop.f32.mrf.mxu0 }
 0x95b   :  { %v621_v51 = vpack.c.bf16 %v620_v49, %v620_v49 }
 0x95c   :  { %v833_v52 = vpop.f32.mrf.mxu0 }
 0x95d   :  { %839 = vmatmul.mubr.msk.bf16.vlgmr.msra.gmra.mxu1 %vm158_vm4, %v621_v51 }
 0xa1d   :  { %v680_v54 = vpop.f32.mrf.mxu1 }
 0xa1e   :  { %v681_v55 = vadd.f32 %v743_v53, %v680_v54 }
 0xa1f   :  { %v840_v56 = vpop.f32.mrf.mxu1 }
 0xa20   :  { %866 = vtanh.f32 %v681_v55 }
 0xa21   :  { %v683_v57 = vpop.f32.mrf.mxu1 }
 0xa23   :  { %v841_v58 = vpop.f32.mrf.mxu1 }
 0xa2d   :  { %v867_v59 = vpop.eup %866 }
 0xa2e   :  { %687 = vst.msk [vmem:[#allocation2] sm:$0xff] %vm80_vm2, %v867_v59 }
 0xa2f   :  { %693 = vst.msk [vmem:[#allocation2] sm:$0xff] %vm692_vm8, %v690_v60 }
 0xa30   :  { %699 = vst.msk [vmem:[#allocation2] sm:$0xff] %vm698_vm9, %v696_v61 }
 0xa31   :  { %879 = shalt.err (!%p876_p4)
}
 0xa32   :  { %709 = dma.vmem_to_hbm [thread:$0]  %s707_s20, 128, %s1069_s5, [#allocation3]  }
 0xa33   :  { %888 = dma.done.wait [#allocation3], 128  }
 0xa34   :  { %889 = vsyncadd [#allocation3], 4294967168 }
 0xa35   :  { %713 = vsyncpa [#allocation3], 1 }

</bundles_post_ra>
